<compile_context>
chip_gen: v7x
topology: tpu7x:2x2x1
jax: 0.10.0
libtpu: 0.0.40
codegen_flags: <defaults>
</compile_context>

<pallas_src>
import jax
import jax.numpy as jnp
from jax.experimental import pallas as pl
from jax.experimental.pallas import tpu as pltpu


def _pick_col_tile(rows, cols, itemsize, max_block_bytes):
    """Largest legal column tile: full width if it fits, else a multiple of 128
    dividing cols whose (rows, tk) block stays under max_block_bytes."""
    if rows * cols * itemsize <= max_block_bytes or cols % 128 != 0:
        return cols
    max_tk = max(128, ((max_block_bytes // (rows * itemsize)) // 128) * 128)
    for cand in range(min(cols, max_tk), 127, -128):
        if cols % cand == 0:
            return cand
    return cols  # fallback: full width is always a legal block


def _make_style_loss_kernel(scale, inv_gram_elems):
    """scale = weight / (N*C*H*W); inv_gram_elems = 1 / (N*C)^2.
    Both are Python floats (compile-time literals, not captured arrays)."""

    def kernel(x_ref, t_ref, g_ref, loss_ref, acc_ref):
        k = pl.program_id(0)

        @pl.when(k == 0)
        def _():
            acc_ref[...] = jnp.zeros_like(acc_ref)

        # Accumulate the Gram matrix: acc += F_k @ F_k.T  (MXU, f32 accumulate)
        f = x_ref[...]
        acc_ref[...] += jnp.dot(f, f.T, preferred_element_type=jnp.float32)

        @pl.when(k == pl.num_programs(0) - 1)
        def _():
            # self.G = gram(x) / total * weight
            g = acc_ref[...] * scale
            g_ref[...] = g.astype(g_ref.dtype)
            # self.loss = MSE(self.G, self.target)  (mean over (N*C)^2 entries)
            diff = g - t_ref[...]
            loss_ref[...] = jnp.sum(diff * diff, keepdims=True) * inv_gram_elems

    return kernel


def make_style_loss(N, C, H, W, weight, *, feature_dtype=jnp.float32,
                    max_block_bytes=4 * 1024 * 1024):
    rows = N * C              # Gram dimension (a*b)
    cols = H * W              # contraction dimension (c*d)
    total = N * C * H * W
    scale = float(weight) / float(total)
    inv_gram_elems = 1.0 / float(rows * rows)

    itemsize = jnp.dtype(feature_dtype).itemsize
    tk = _pick_col_tile(rows, cols, itemsize, max_block_bytes)
    kt = cols // tk

    grid_spec = pltpu.PrefetchScalarGridSpec(
        num_scalar_prefetch=0,
        grid=(kt,),
        in_specs=[
            # Streamed feature column blocks (native dtype, no wrapper cast).
            pl.BlockSpec((rows, tk), lambda k: (0, k)),
            # Target Gram (already * weight): tiny, resident across the grid.
            pl.BlockSpec((rows, rows), lambda k: (0, 0)),
        ],
        out_specs=(
            pl.BlockSpec((rows, rows), lambda k: (0, 0)),   # self.G (resident)
            pl.BlockSpec((1, 1), lambda k: (0, 0)),         # scalar loss
        ),
        scratch_shapes=[pltpu.VMEM((rows, rows), jnp.float32)],  # Gram acc
    )

    call = pl.pallas_call(
        _make_style_loss_kernel(scale, inv_gram_elems),
        out_shape=(
            jax.ShapeDtypeStruct((rows, rows), jnp.float32),  # self.G
            jax.ShapeDtypeStruct((1, 1), jnp.float32),        # self.loss
        ),
        grid_spec=grid_spec,
        compiler_params=pltpu.CompilerParams(
            # Single reduction axis with a resident accumulator/output.
            dimension_semantics=("arbitrary",),
            # Keeps double-buffered <=4 MiB blocks comfortable on every gen
            # (v7x scoped default is 32 MiB of 64 MiB physical).
            vmem_limit_bytes=32 * 1024 * 1024,
        ),
    )

    def forward(x_nchw, target_gram_scaled):
        # `self.output = input.clone(); return self.output` — JAX arrays are
        # immutable, so return the input directly (no kernel writeback).
        f2 = x_nchw.reshape(rows, cols)
        t2 = target_gram_scaled.astype(jnp.float32)
        G, loss = call(f2, t2)
        return x_nchw, G, loss[0, 0]

    return forward


if __name__ == "__main__":
    N, C, H, W = 2, 4, 16, 16
    weight = 1000.0  # typical style weight (fixed at module construction)

    key = jax.random.PRNGKey(0)
    k_in, k_style = jax.random.split(key)
    x = jax.random.normal(k_in, (N, C, H, W), dtype=jnp.float32)
    style_feat = jax.random.normal(k_style, (N, C, H, W), dtype=jnp.float32)

    def gram_ref(feat):
        a, b, c, d = feat.shape
        f = feat.reshape(a * b, c * d).astype(jnp.float32)
        g = jnp.dot(f, f.T, precision=jax.lax.Precision.HIGHEST)
        return g / (a * b * c * d)

    # self.target = GramMatrix()(style_feature).detach() * weight
    target_gram_scaled = gram_ref(style_feat) * weight

    fwd = make_style_loss(N, C, H, W, weight, feature_dtype=x.dtype)
    out, G, loss = fwd(x, target_gram_scaled)
    jax.block_until_ready((out, G, loss))

    # Pure-JAX reference check.
    ref_G = gram_ref(x) * weight
    ref_loss = jnp.mean((ref_G - target_gram_scaled) ** 2)

    assert jnp.allclose(out, x), "StyleLoss forward must return its input unchanged"
    assert jnp.allclose(G, ref_G, rtol=1e-4, atol=1e-5), (G, ref_G)
    assert jnp.allclose(loss, ref_loss, rtol=1e-4, atol=1e-6), (loss, ref_loss)

    print("KERNEL_OK")
</pallas_src>

<mosaic_0001>
module attributes {stable_mosaic.version = 11 : i64} {
  func.func @kernel(%arg0: i32, %arg1: memref<8x256xf32, #tpu.memory_space<vmem>>, %arg2: memref<8x8xf32, #tpu.memory_space<vmem>>, %arg3: memref<8x8xf32, #tpu.memory_space<vmem>>, %arg4: memref<1x1xf32, #tpu.memory_space<vmem>>, %arg5: memref<8x8xf32, #tpu.memory_space<vmem>>) attributes {dimension_semantics = [#tpu.dimension_semantics<arbitrary>], iteration_bounds = array<i64: 1>, scalar_prefetch = 0 : i64, scratch_operands = 1 : i64, tpu.core_type = #tpu.core_type<tc>, window_params = [{transform_indices = @transform_0, window_bounds = array<i64: 8, 256>}, {pipeline_mode = #tpu.pipeline_mode<synchronous>, transform_indices = @transform_1, window_bounds = array<i64: 8, 8>}, {pipeline_mode = #tpu.pipeline_mode<synchronous>, transform_indices = @transform_2, window_bounds = array<i64: 8, 8>}, {pipeline_mode = #tpu.pipeline_mode<synchronous>, transform_indices = @transform_3, window_bounds = array<i64: 1, 1>}]} {
    %c0_i32 = arith.constant 0 : i32
    %0 = arith.cmpi eq, %arg0, %c0_i32 : i32
    %1 = arith.extui %0 : i1 to i32
    %c0_i32_0 = arith.constant 0 : i32
    %2 = arith.cmpi ne, %1, %c0_i32_0 : i32
    scf.if %2 {
      %cst_8 = arith.constant 0.000000e+00 : f32
      %12 = vector.broadcast %cst_8 : f32 to vector<8x8xf32>
      %c0_9 = arith.constant 0 : index
      %c0_10 = arith.constant 0 : index
      %13 = vector.load %arg5[%c0_9, %c0_10] : memref<8x8xf32, #tpu.memory_space<vmem>>, vector<8x8xf32>
      tpu.vector_store %arg5[%c0_9, %c0_10], %12 {strides = array<i32>} : memref<8x8xf32, #tpu.memory_space<vmem>>, vector<8x8xf32>,
    } else {
    }
    %c0 = arith.constant 0 : index
    %c0_1 = arith.constant 0 : index
    %3 = vector.load %arg1[%c0, %c0_1] : memref<8x256xf32, #tpu.memory_space<vmem>>, vector<8x256xf32>
    %c0_2 = arith.constant 0 : index
    %c0_3 = arith.constant 0 : index
    %4 = vector.load %arg5[%c0_2, %c0_3] : memref<8x8xf32, #tpu.memory_space<vmem>>, vector<8x8xf32>
    %5 = tpu.transpose %3, [1, 0] : vector<8x256xf32> -> vector<256x8xf32>
    %cst = arith.constant dense<0.000000e+00> : vector<8x8xf32>
    %6 = tpu.matmul %3, %5, %cst {dimension_numbers = #tpu.dot_dimension_numbers<[1], [0], [0], [1], [0, 0, 1, 1], [], []>} : vector<8x256xf32>, vector<256x8xf32>, vector<8x8xf32> -> vector<8x8xf32>
    %7 = arith.addf %4, %6 : vector<8x8xf32>
    %c0_4 = arith.constant 0 : index
    %c0_5 = arith.constant 0 : index
    %8 = vector.load %arg5[%c0_4, %c0_5] : memref<8x8xf32, #tpu.memory_space<vmem>>, vector<8x8xf32>
    tpu.vector_store %arg5[%c0_4, %c0_5], %7 {strides = array<i32>} : memref<8x8xf32, #tpu.memory_space<vmem>>, vector<8x8xf32>,
    %c0_i32_6 = arith.constant 0 : i32
    %9 = arith.cmpi eq, %arg0, %c0_i32_6 : i32
    %10 = arith.extui %9 : i1 to i32
    %c0_i32_7 = arith.constant 0 : i32
    %11 = arith.cmpi ne, %10, %c0_i32_7 : i32
    scf.if %11 {
      %c0_8 = arith.constant 0 : index
      %c0_9 = arith.constant 0 : index
      %12 = vector.load %arg5[%c0_8, %c0_9] : memref<8x8xf32, #tpu.memory_space<vmem>>, vector<8x8xf32>
      %cst_10 = arith.constant 0.48828125 : f32
      %13 = vector.broadcast %cst_10 : f32 to vector<8x8xf32>
      %14 = arith.mulf %12, %13 : vector<8x8xf32>
      %c0_11 = arith.constant 0 : index
      %c0_12 = arith.constant 0 : index
      %15 = vector.load %arg3[%c0_11, %c0_12] : memref<8x8xf32, #tpu.memory_space<vmem>>, vector<8x8xf32>
      tpu.vector_store %arg3[%c0_11, %c0_12], %14 {strides = array<i32>} : memref<8x8xf32, #tpu.memory_space<vmem>>, vector<8x8xf32>,
      %c0_13 = arith.constant 0 : index
      %c0_14 = arith.constant 0 : index
      %16 = vector.load %arg2[%c0_13, %c0_14] : memref<8x8xf32, #tpu.memory_space<vmem>>, vector<8x8xf32>
      %17 = arith.subf %14, %16 : vector<8x8xf32>
      %18 = arith.mulf %17, %17 : vector<8x8xf32>
      %19 = vector.shape_cast %18 : vector<8x8xf32> to vector<1x8x8xf32>
      %cst_15 = arith.constant dense<0.000000e+00> : vector<1xf32>
      %20 = vector.multi_reduction <add>, %19, %cst_15 [1, 2] : vector<1x8x8xf32> to vector<1xf32>
      %21 = vector.shape_cast %20 : vector<1xf32> to vector<1x1x1xf32>
      %22 = vector.extract %21[0, 0, 0] : f32 from vector<1x1x1xf32>
      %23 = vector.broadcast %22 : f32 to vector<1x1xf32>
      %cst_16 = arith.constant 1.562500e-02 : f32
      %24 = vector.broadcast %cst_16 : f32 to vector<1x1xf32>
      %25 = arith.mulf %23, %24 : vector<1x1xf32>
      %c0_17 = arith.constant 0 : index
      %c0_18 = arith.constant 0 : index
      %26 = vector.load %arg4[%c0_17, %c0_18] : memref<1x1xf32, #tpu.memory_space<vmem>>, vector<1x1xf32>
      tpu.vector_store %arg4[%c0_17, %c0_18], %25 {strides = array<i32>} : memref<1x1xf32, #tpu.memory_space<vmem>>, vector<1x1xf32>,
    } else {
    }
    return
  }
  func.func @transform_0(%arg0: i32) -> (i32, i32) {
    %c0_i32 = arith.constant 0 : i32
    %c0_i32_0 = arith.constant 0 : i32
    return %c0_i32, %arg0 : i32, i32
  }
  func.func @transform_1(%arg0: i32) -> (i32, i32) {
    %c0_i32 = arith.constant 0 : i32
    %c0_i32_0 = arith.constant 0 : i32
    %c0_i32_1 = arith.constant 0 : i32
    return %c0_i32, %c0_i32_0 : i32, i32
  }
  func.func @transform_2(%arg0: i32) -> (i32, i32) {
    %c0_i32 = arith.constant 0 : i32
    %c0_i32_0 = arith.constant 0 : i32
    %c0_i32_1 = arith.constant 0 : i32
    return %c0_i32, %c0_i32_0 : i32, i32
  }
  func.func @transform_3(%arg0: i32) -> (i32, i32) {
    %c0_i32 = arith.constant 0 : i32
    %c0_i32_0 = arith.constant 0 : i32
    %c0_i32_1 = arith.constant 0 : i32
    return %c0_i32, %c0_i32_0 : i32, i32
  }
}

</mosaic_0001>

<bundles_post_ra>
// kernel: tpu_custom_call.1
= control target key start
LH: loop header
LB: loop body
LE: loop exit
PB: predicated region body
PF: predicated region fallthrough
CT: control target
= control target key end

     0   :  { %9 = vsyncpa [#allocation4], 0  ;;  %s354_s0 = inlined_call_operand.hbm [shape: f32[8,256], index: 0, kind: input, shape index: {}]   ;;  %s355_s1 = inlined_call_operand.hbm [shape: f32[8,8], index: 1, kind: input, shape index: {}]   ;;  %s356_s2 = inlined_call_operand.hbm [shape: f32[8,8], index: 2, kind: output, shape index: {0}]   ;;  %s357_s3 = inlined_call_operand.hbm [shape: f32[1,1], index: 3, kind: output, shape index: {1}]  }
   0x1   :  { %10 = vsyncpa [#allocation7], 0 }
   0x2   :  { %11 = vsyncpa [#allocation5], 0 }
   0x3   :  { %12 = vsyncpa [#allocation10], 0  ;;  %s277_s12 = smov [#allocation3]   ;;  %s278_s14 = smov [#allocation6]  }
   0x4   :  { %s19_s13 = sshll.u32 %s277_s12, 4  ;;  %s29_s15 = sshll.u32 %s278_s14, 4  ;;  %s20_s13 = int_to_ptr.vmem [resolvable:$true] %s19_s13  ;;  %s30_s15 = int_to_ptr.vmem [resolvable:$true] %s29_s15 }
   0x5   :  { %s181_s18 = scalar_lea.hbm %s354_s0, 256 }
   0x6   :  { %p182_p0 = scmp.ne.s32.totalorder %s354_s0, %s181_s18  ;;  %p185_p1 = scmp.lt.u32.totalorder %s181_s18, %s354_s0 }
   0x8   :  { %p187_p2 = pnand %p185_p1, %p182_p0 }
   0xa   :  { %190 = shalt.err (!%p187_p2)
}
   0xb   :  { %s191_s23 = scalar_lea.vmem %s20_s13, 256  ;;  %p196_p4 = scmp.lt.s32.totalorder %s20_s13, %s20_s13 }
   0xc   :  { %p192_p3 = scmp.ne.s32.totalorder %s20_s13, %s191_s23  ;;  %p197_p5 = scmp.lt.s32.totalorder %s191_s23, %s191_s23 }
   0xe   :  { %p198_p6 = por %p197_p5, %p196_p4 }
  0x10   :  { %p199_p7 = pnand %p198_p6, %p192_p3 }
  0x12   :  { %202 = shalt.err (!%p199_p7)
}
  0x13   :  { %22 = dma.hbm_to_vmem [thread:$0]  %s354_s0, 256, %s20_s13, [#allocation4]  }
  0x14   :  { %s203_s28 = scalar_lea.hbm %s355_s1, 128 }
  0x15   :  { %p204_p8 = scmp.ne.s32.totalorder %s355_s1, %s203_s28  ;;  %p207_p9 = scmp.lt.u32.totalorder %s203_s28, %s355_s1 }
  0x17   :  { %p209_p10 = pnand %p207_p9, %p204_p8 }
  0x19   :  { %212 = shalt.err (!%p209_p10)
}
  0x1a   :  { %s213_s6 = scalar_lea.vmem %s30_s15, 128  ;;  %p218_p12 = scmp.lt.s32.totalorder %s30_s15, %s30_s15 }
  0x1b   :  { %p214_p11 = scmp.ne.s32.totalorder %s30_s15, %s213_s6  ;;  %p219_p13 = scmp.lt.s32.totalorder %s213_s6, %s213_s6 }
  0x1d   :  { %p220_p0 = por %p219_p13, %p218_p12 }
  0x1f   :  { %p221_p1 = pnand %p220_p0, %p214_p11 }
  0x21   :  { %224 = shalt.err (!%p221_p1)
}
  0x22   :  { %32 = dma.hbm_to_vmem [thread:$0]  %s355_s1, 128, %s30_s15, [#allocation7]  }
  0x23   :  { %269 = dma.done.wait [#allocation4], 256  }
  0x24   :  { %270 = vsyncadd [#allocation4], 4294967040 }
  0x25   :  { %271 = dma.done.wait [#allocation7], 128  }
  0x26   :  { %272 = vsyncadd [#allocation7], 4294967168  ;;  %vm43_vm0 = vcmask 64512   ;;  %v279_v0 = vmov 0.0   ;;  %v46_v1 = vld [vmem:[#allocation3 + $0x8] sm:$0xff]  ;;  %v45_v2 = vld [vmem:[#allocation3] sm:$0xff] }
  0x27   :  { %44 = vst.msk [vmem:[#allocation2] sm:$0xff] %vm43_vm0, %v279_v0  ;;  %48 = vmatprep.subr.mxu0 %v46_v1  ;;  %112 = vmatprep.mubr.f32.mxu0 %v46_v1  ;;  %v127_v8 = vld [vmem:[#allocation6] sm:$0xff]  ;;  %s280_s1 = smov [#allocation8]  }
  0x28   :  { %49 = vmatpush1.xpose.msra.mxu0 %v45_v2  ;;  %s150_s8 = sshll.u32 %s280_s1, 4  ;;  %s151_s8 = int_to_ptr.vmem [resolvable:$true] %s150_s8 }
  0x29   :  { %s225_s9 = scalar_lea.vmem %s151_s8, 128  ;;  %p230_p3 = scmp.lt.s32.totalorder %s151_s8, %s151_s8 }
  0x2a   :  { %p226_p2 = scmp.ne.s32.totalorder %s151_s8, %s225_s9  ;;  %p231_p4 = scmp.lt.s32.totalorder %s225_s9, %s225_s9 }
  0x2b   :  { %113 = vmatmul.mubr.f32.vlgmr.msra.gmra.mrb[0].mxu0 %v45_v2 }
  0x2c   :  { %p232_p5 = por %p231_p4, %p230_p3 }
  0x2e   :  { %v47_v3 = vld [vmem:[#allocation2] sm:$0xff]  ;;  %p233_p6 = pnand %p232_p5, %p226_p2 }
  0xfe   :  { %v114_v4 = vpop.f32.mrb[0].mxu0 }
  0xff   :  { %v118_v5 = vadd.f32 %v114_v4, %v47_v3  ;;  %v116_v6 = vpop.f32.mrb[1].mxu0 }
 0x101   :  { %120 = vst.msk [vmem:[#allocation2] sm:$0xff] %vm43_vm0, %v118_v5 }
 0x108   :  { %v124_v7 = vld [vmem:[#allocation2] sm:$0xff] }
 0x109   :  { %v125_v9 = vmul.f32 0.48828125, %v124_v7 }
 0x10b   :  { %v128_v10 = vsub.f32 %v125_v9, %v127_v8  ;;  %126 = vst.msk [vmem:[#allocation8] sm:$0xff] %vm43_vm0, %v125_v9 }
 0x10d   :  { %v129_v11 = vmul.f32 %v128_v10, %v128_v10 }
 0x10f   :  { %v130_v12 = vsel %vm43_vm0, %v129_v11, 0.0 }
 0x110   :  { %131 = vadd.xlane.f32.xlu0 %v130_v12 }
 0x111   :  { %236 = shalt.err (!%p233_p6)
}
 0x112   :  { %s237_s12 = scalar_lea.hbm %s356_s2, 128 }
 0x113   :  { %p238_p7 = scmp.ne.s32.totalorder %s356_s2, %s237_s12  ;;  %p241_p8 = scmp.lt.u32.totalorder %s237_s12, %s356_s2 }
 0x115   :  { %p243_p9 = pnand %p241_p8, %p238_p7 }
 0x117   :  { %246 = shalt.err (!%p243_p9)
}
 0x118   :  { %153 = dma.vmem_to_hbm [thread:$0]  %s151_s8, 128, %s356_s2, [#allocation5]   ;;  %vm142_vm1 = vcmask 0  }
 0x119   :  { %s281_s19 = smov [#allocation9]  }
 0x11a   :  { %s160_s20 = sshll.u32 %s281_s19, 4  ;;  %s161_s20 = int_to_ptr.vmem [resolvable:$true] %s160_s20 }
 0x11b   :  { %s247_s22 = scalar_lea.vmem %s161_s20, 16  ;;  %s251_s23 = scalar_lea.vmem %s161_s20, 32 }
 0x11c   :  { %p248_p10 = scmp.ne.s32.totalorder %s161_s20, %s247_s22  ;;  %p252_p11 = scmp.lt.s32.totalorder %s161_s20, %s161_s20 }
 0x11d   :  { %p253_p12 = scmp.lt.s32.totalorder %s251_s23, %s247_s22 }
 0x11f   :  { %p254_p13 = por %p253_p12, %p252_p11 }
 0x121   :  { %p255_p0 = pnand %p254_p13, %p248_p10 }
 0x19d   :  { %v132_v13 = vpop.xlane.xlu0 %131 }
 0x19e   :  { %v133_v14 = vrot.slane %v132_v13, 4 }
 0x1a0   :  { %v134_v15 = vadd.f32 %v133_v14, %v132_v13 }
 0x1a2   :  { %v135_v16 = vrot.slane %v134_v15, 2 }
 0x1a4   :  { %v136_v17 = vadd.f32 %v135_v16, %v134_v15 }
 0x1a6   :  { %v137_v18 = vrot.slane %v136_v17, 1 }
 0x1a8   :  { %v138_v19 = vadd.f32 %v137_v18, %v136_v17 }
 0x1aa   :  { %174 = vpush %v138_v19 }
 0x1db   :  { %s175_s21 = spop %174 }
 0x1dc   :  { %v140_v20 = vstv %s175_s21 }
 0x1dd   :  { %v141_v21 = vmul.f32 0.015625, %v140_v20 }
 0x1df   :  { %143 = vst.msk [vmem:[#allocation9] sm:$0x1] %vm142_vm1, %v141_v21 }
 0x1e0   :  { %258 = shalt.err (!%p255_p0)
}
 0x1e1   :  { %s259_s25 = scalar_lea.hbm %s357_s3, 16 }
 0x1e2   :  { %p260_p1 = scmp.ne.s32.totalorder %s357_s3, %s259_s25  ;;  %p263_p2 = scmp.lt.u32.totalorder %s259_s25, %s357_s3 }
 0x1e4   :  { %p265_p3 = pnand %p263_p2, %p260_p1 }
 0x1e6   :  { %268 = shalt.err (!%p265_p3)
}
 0x1e7   :  { %163 = dma.vmem_to_hbm [thread:$0]  %s161_s20, 16, %s357_s3, [#allocation10]  }
 0x1e8   :  { %273 = dma.done.wait [#allocation5], 128  }
 0x1e9   :  { %274 = vsyncadd [#allocation5], 4294967168 }
 0x1ea   :  { %275 = dma.done.wait [#allocation10], 16  }
 0x1eb   :  { %276 = vsyncadd [#allocation10], 4294967280 }
 0x1ec   :  { %170 = vsyncpa [#allocation4], 1 }
 0x1ed   :  { %171 = vsyncpa [#allocation7], 1 }
 0x1ee   :  { %172 = vsyncpa [#allocation5], 1 }
 0x1ef   :  { %173 = vsyncpa [#allocation10], 1 }

</bundles_post_ra>
